<compile_context>
chip_gen: v5e
topology: v5e:2x2
jax: 0.10.0
libtpu: 0.0.40
codegen_flags: <defaults>
</compile_context>

<pallas_src>
import functools
import math

import jax
import jax.numpy as jnp
from jax.experimental import pallas as pl
from jax.experimental.pallas import tpu as pltpu


def _dice_kernel(pred_ref, tgt_ref, num_ref, den_ref, num_acc, den_acc, *,
                 p_exp, s_true, r_tile, blocks_per_split, any_mask):
    r = pl.program_id(2)

    @pl.when(r == 0)
    def _():
        num_acc[...] = jnp.zeros_like(num_acc)
        den_acc[...] = jnp.zeros_like(den_acc)

    C = pred_ref.shape[1]
    Rt = pred_ref.shape[2]
    Racc = num_acc.shape[1]

    # Global row-block index (needed for the boundary mask).
    blk = pl.program_id(0) * blocks_per_split + r

    def _accumulate(mask_cols):
        # Cast after load (no wrapper-side HBM copies); accumulate in f32.
        x = pred_ref[0].astype(jnp.float32)            # (C, Rt, 128) logits
        tgt = tgt_ref[0, 0].astype(jnp.int32)          # (Rt, 128) class indices

        # Max-stabilized softmax over the class axis.  C is a leading (slab)
        # axis, so max/sum over it are pure elementwise VPU ops — no XLU.
        m = jnp.max(x, axis=0, keepdims=True)          # (1, Rt, 128)
        e = jnp.exp(x - m)                             # EUP
        s = jnp.sum(e, axis=0, keepdims=True)          # (1, Rt, 128)
        prob = e * (1.0 / s)                           # exact recip keeps 1e-5 tol

        # One-hot target as a boolean mask (never materialized as f32 onehot
        # except the cheap 0/1 cast used for the denominator).
        cls = jax.lax.broadcasted_iota(jnp.int32, (C, Rt, 128), 0)
        hit = cls == tgt[None]

        if mask_cols:
            # Positions past the true spatial extent (partial last 128-row or
            # out-of-bounds rows of the last block) must not contribute.
            # Mask prob BEFORE pp / sums so garbage (Inf/NaN) reads stay safe.
            row = jax.lax.broadcasted_iota(jnp.int32, (Rt, 128), 0)
            lane = jax.lax.broadcasted_iota(jnp.int32, (Rt, 128), 1)
            flat = blk * (r_tile * 128) + row * 128 + lane
            valid = flat < s_true
            prob = jnp.where(valid[None], prob, 0.0)
            hit = jnp.logical_and(hit, valid[None])

        # prob**p: VPU multiplies for small integer p (avoid EUP pow).
        if p_exp == 1:
            pp = prob
        elif p_exp == 2:
            pp = prob * prob
        elif isinstance(p_exp, int) and p_exp > 2:
            pp = prob
            for _ in range(p_exp - 1):
                pp = pp * prob
        else:
            pp = prob ** p_exp

        hit_f = hit.astype(jnp.float32)
        c_num = jnp.where(hit, prob, 0.0)              # (C, Rt, 128)
        c_den = pp + hit_f                             # onehot**p == onehot

        # Wide accumulators: elementwise adds only; no per-tile XLU reduces.
        if Rt == Racc:
            num_acc[...] += c_num
            den_acc[...] += c_den
        else:
            g = Rt // Racc                             # Rt is a multiple of 8
            num_acc[...] += jnp.sum(c_num.reshape(C, g, Racc, 128), axis=1)
            den_acc[...] += jnp.sum(c_den.reshape(C, g, Racc, 128), axis=1)

    if not any_mask:
        _accumulate(False)
    else:
        # Only blocks reaching past the valid region pay the mask cost.
        boundary = (blk + 1) * (r_tile * 128) > s_true

        @pl.when(jnp.logical_not(boundary))
        def _():
            _accumulate(False)

        @pl.when(boundary)
        def _():
            _accumulate(True)

    # Output block index is constant across the row axis -> resident output;
    # single cross-lane/sublane tree reduce + write-back once per (split, n).
    @pl.when(r == pl.num_programs(2) - 1)
    def _():
        num_ref[0, 0] = jnp.sum(
            jnp.sum(num_acc[...], axis=2, keepdims=True), axis=1)   # (C, 1)
        den_ref[0, 0] = jnp.sum(
            jnp.sum(den_acc[...], axis=2, keepdims=True), axis=1)   # (C, 1)


def _vmem_limit_bytes():
    """Generation-aware scoped-VMEM limit: ~half of physical capacity
    (64 MiB on 128-MiB v5e/v6e, 32 MiB on 64-MiB-per-TC v7x)."""
    try:
        cap = int(pltpu.get_tpu_info().vmem_capacity_bytes)
    except Exception:
        cap = 64 * 1024 * 1024          # conservative fallback (v7x per-TC)
    return max(16 * 1024 * 1024, min(cap // 2, 64 * 1024 * 1024))


def _choose_row_tile(r128, C, pred_itemsize, tgt_itemsize, vmem_limit):
    """Largest row tile (multiple of 8 sublanes) whose double-buffered input
    blocks plus the ~6 block-sized f32 live intermediates the kernel body
    keeps (cast, exp, prob, prob^2, hit, contribs) fit inside the limit."""
    if r128 <= 8:
        return r128
    budget = vmem_limit - 6 * 1024 * 1024          # headroom: scratch/outputs/compiler
    per_row = 128 * (2 * (C * pred_itemsize + tgt_itemsize)   # 2x-buffered inputs
                     + 6 * C * 4 + 2 * 4)                      # f32 intermediates
    r = max(8, min(budget // per_row, r128))
    return int(r // 8) * 8


def dice_loss(predict, target, *, smooth=1.0, p=2, reduction="mean",
              weight=None, ignore_index=None):
    """JAX/Pallas equivalent of DiceLoss.forward.

    predict: [N, C, *spatial] float logits
    target:  [N, *spatial]    integer class indices in [0, C)
    """
    N, C = int(predict.shape[0]), int(predict.shape[1])
    S = int(math.prod(predict.shape[2:]))

    S128 = ((S + 127) // 128) * 128
    R128 = S128 // 128

    # Reshape only (row-major, free); dtype handling is in-kernel.
    pred_r = predict.reshape(N, C, S)
    tgt_r = target.reshape(N, 1, S)
    if jnp.issubdtype(tgt_r.dtype, jnp.floating) or tgt_r.dtype.itemsize > 4:
        tgt_r = tgt_r.astype(jnp.int32)    # narrow the target stream
    if S128 != S:
        # TODO(synk): only the rare S % 128 != 0 case pays this one pad copy;
        # the padded columns are masked out in-kernel.
        pred_r = jnp.pad(pred_r, ((0, 0), (0, 0), (0, S128 - S)))
        tgt_r = jnp.pad(tgt_r, ((0, 0), (0, 0), (0, S128 - S)))
    pred_r = pred_r.reshape(N, C, R128, 128)
    tgt_r = tgt_r.reshape(N, 1, R128, 128)

    vmem_limit = _vmem_limit_bytes()
    r_tile = _choose_row_tile(R128, C, pred_r.dtype.itemsize,
                              tgt_r.dtype.itemsize, vmem_limit)
    n_blocks = -(-R128 // r_tile)
    # Split the reduction axis so both v7x TensorCores stay busy when N is
    # small/odd; harmless on single-TC v5e/v6e.
    n_split = 2 if (n_blocks >= 2 and n_blocks % 2 == 0) else 1
    bps = n_blocks // n_split
    any_mask = (S128 != S) or (R128 % r_tile != 0)
    racc = 8 if (r_tile % 8 == 0) else r_tile

    kernel = functools.partial(
        _dice_kernel, p_exp=p, s_true=S, r_tile=r_tile,
        blocks_per_split=bps, any_mask=any_mask)

    cost = pl.CostEstimate(
        flops=10 * N * C * S,
        transcendentals=N * C * S,
        bytes_accessed=N * C * S128 * pred_r.dtype.itemsize
        + N * S128 * tgt_r.dtype.itemsize + 2 * n_split * N * C * 4,
    )

    num_parts, den_parts = pl.pallas_call(
        kernel,
        out_shape=(jax.ShapeDtypeStruct((n_split, N, C, 1), jnp.float32),
                   jax.ShapeDtypeStruct((n_split, N, C, 1), jnp.float32)),
        grid=(n_split, N, bps),
        in_specs=[
            pl.BlockSpec((1, C, r_tile, 128),
                         lambda sp, n, r: (n, 0, sp * bps + r, 0)),
            pl.BlockSpec((1, 1, r_tile, 128),
                         lambda sp, n, r: (n, 0, sp * bps + r, 0)),
        ],
        out_specs=(
            pl.BlockSpec((1, 1, C, 1), lambda sp, n, r: (sp, n, 0, 0)),
            pl.BlockSpec((1, 1, C, 1), lambda sp, n, r: (sp, n, 0, 0)),
        ),
        scratch_shapes=[
            pltpu.VMEM((C, racc, 128), jnp.float32),   # num accumulator
            pltpu.VMEM((C, racc, 128), jnp.float32),   # den accumulator
        ],
        compiler_params=pltpu.CompilerParams(
            dimension_semantics=("parallel", "parallel", "arbitrary"),
            vmem_limit_bytes=vmem_limit),
        cost_estimate=cost,
    )(pred_r, tgt_r)

    # Combine split partials and finalize per-sample / per-class binary dice.
    num = jnp.sum(num_parts[..., 0], axis=0)           # (N, C)
    den = jnp.sum(den_parts[..., 0], axis=0)           # (N, C)
    loss_nc = 1.0 - (num + smooth) / (den + smooth)    # (N, C)

    # BinaryDiceLoss reduction over the batch dim.
    if reduction == "mean":
        per_class = jnp.mean(loss_nc, axis=0)          # (C,)
    elif reduction == "sum":
        per_class = jnp.sum(loss_nc, axis=0)           # (C,)
    elif reduction == "none":
        per_class = loss_nc.T                          # (C, N)
    else:
        raise Exception("Unexpected reduction {}".format(reduction))

    # DiceLoss outer loop: skip ignore_index, optional per-class weight,
    # sum over classes, divide by number of classes.
    total = jnp.zeros_like(per_class[0])
    for i in range(C):
        if i == ignore_index:
            continue
        dl = per_class[i]
        if weight is not None:
            dl = dl * weight[i]
        total = total + dl
    return total / C


def _dice_loss_ref(predict, target, *, smooth=1.0, p=2):
    """Pure-jnp reference (mirrors the PyTorch code) for a sanity check."""
    N, C = predict.shape[0], predict.shape[1]
    prob = jax.nn.softmax(predict.astype(jnp.float32), axis=1)
    onehot = jax.nn.one_hot(target, C, axis=1, dtype=jnp.float32)
    total = 0.0
    for i in range(C):
        pr = prob[:, i].reshape(N, -1)
        tg = onehot[:, i].reshape(N, -1)
        num = jnp.sum(pr * tg, axis=1) + smooth
        den = jnp.sum(pr ** p + tg ** p, axis=1) + smooth
        total = total + jnp.mean(1.0 - num / den)
    return total / C


if __name__ == "__main__":
    key = jax.random.PRNGKey(0)
    k1, k2, k3, k4 = jax.random.split(key, 4)

    # Case 1: S a multiple of 128 (no masking, no padding).
    N, C, H, W = 2, 4, 16, 16
    predict = jax.random.normal(k1, (N, C, H, W), dtype=jnp.float32)
    target = jax.random.randint(k2, (N, H, W), 0, C, dtype=jnp.int32)
    out = jax.block_until_ready(dice_loss(predict, target))
    ref = _dice_loss_ref(predict, target)
    assert jnp.allclose(out, ref, atol=1e-5, rtol=1e-5), (out, ref)

    # Case 2: S not a multiple of 128 (exercises the masked boundary block).
    N2, C2, H2, W2 = 1, 3, 10, 10
    predict2 = jax.random.normal(k3, (N2, C2, H2, W2), dtype=jnp.float32)
    target2 = jax.random.randint(k4, (N2, H2, W2), 0, C2, dtype=jnp.int32)
    out2 = jax.block_until_ready(dice_loss(predict2, target2))
    ref2 = _dice_loss_ref(predict2, target2)
    assert jnp.allclose(out2, ref2, atol=1e-5, rtol=1e-5), (out2, ref2)

    print("KERNEL_OK")
</pallas_src>

<mosaic_0001>
module attributes {stable_mosaic.version = 11 : i64} {
  func.func @_dice_kernel(%arg0: i32, %arg1: i32, %arg2: i32, %arg3: memref<1x4x2x128xf32, #tpu.memory_space<vmem>>, %arg4: memref<1x1x2x128xi32, #tpu.memory_space<vmem>>, %arg5: memref<1x1x4x1xf32, #tpu.memory_space<vmem>>, %arg6: memref<1x1x4x1xf32, #tpu.memory_space<vmem>>, %arg7: memref<4x2x128xf32, #tpu.memory_space<vmem>>, %arg8: memref<4x2x128xf32, #tpu.memory_space<vmem>>) attributes {dimension_semantics = [#tpu.dimension_semantics<parallel>, #tpu.dimension_semantics<parallel>, #tpu.dimension_semantics<arbitrary>], iteration_bounds = array<i64: 1, 2, 1>, scalar_prefetch = 0 : i64, scratch_operands = 2 : i64, tpu.core_type = #tpu.core_type<tc>, window_params = [{transform_indices = @transform_0, window_bounds = array<i64: 1, 4, 2, 128>}, {transform_indices = @transform_1, window_bounds = array<i64: 1, 1, 2, 128>}, {transform_indices = @transform_2, window_bounds = array<i64: 1, 1, 4, 1>}, {transform_indices = @transform_3, window_bounds = array<i64: 1, 1, 4, 1>}]} {
    %c0_i32 = arith.constant 0 : i32
    %0 = arith.cmpi eq, %arg2, %c0_i32 : i32
    %1 = arith.extui %0 : i1 to i32
    %c0_i32_0 = arith.constant 0 : i32
    %2 = arith.cmpi ne, %1, %c0_i32_0 : i32
    scf.if %2 {
      %cst_25 = arith.constant 0.000000e+00 : f32
      %37 = vector.broadcast %cst_25 : f32 to vector<4x2x128xf32>
      %c0_26 = arith.constant 0 : index
      %c0_27 = arith.constant 0 : index
      %c0_28 = arith.constant 0 : index
      %38 = vector.load %arg7[%c0_26, %c0_27, %c0_28] : memref<4x2x128xf32, #tpu.memory_space<vmem>>, vector<4x2x128xf32>
      tpu.vector_store %arg7[%c0_26, %c0_27, %c0_28], %37 {strides = array<i32>} : memref<4x2x128xf32, #tpu.memory_space<vmem>>, vector<4x2x128xf32>,
      %cst_29 = arith.constant 0.000000e+00 : f32
      %39 = vector.broadcast %cst_29 : f32 to vector<4x2x128xf32>
      %c0_30 = arith.constant 0 : index
      %c0_31 = arith.constant 0 : index
      %c0_32 = arith.constant 0 : index
      %40 = vector.load %arg8[%c0_30, %c0_31, %c0_32] : memref<4x2x128xf32, #tpu.memory_space<vmem>>, vector<4x2x128xf32>
      tpu.vector_store %arg8[%c0_30, %c0_31, %c0_32], %39 {strides = array<i32>} : memref<4x2x128xf32, #tpu.memory_space<vmem>>, vector<4x2x128xf32>,
    } else {
    }
    %c0 = arith.constant 0 : index
    %c0_1 = arith.constant 0 : index
    %c0_2 = arith.constant 0 : index
    %c0_3 = arith.constant 0 : index
    %3 = vector.load %arg3[%c0, %c0_1, %c0_2, %c0_3] : memref<1x4x2x128xf32, #tpu.memory_space<vmem>>, vector<1x4x2x128xf32>
    %4 = vector.shape_cast %3 : vector<1x4x2x128xf32> to vector<4x2x128xf32>
    %c0_4 = arith.constant 0 : index
    %c0_5 = arith.constant 0 : index
    %c0_6 = arith.constant 0 : index
    %c0_7 = arith.constant 0 : index
    %5 = vector.load %arg4[%c0_4, %c0_5, %c0_6, %c0_7] : memref<1x1x2x128xi32, #tpu.memory_space<vmem>>, vector<1x1x2x128xi32>
    %6 = vector.shape_cast %5 : vector<1x1x2x128xi32> to vector<2x128xi32>
    %cst = arith.constant dense<0xFF800000> : vector<2x128xf32>
    %7 = vector.multi_reduction <maximumf>, %4, %cst [0] : vector<4x2x128xf32> to vector<2x128xf32>
    %8 = vector.shape_cast %7 : vector<2x128xf32> to vector<1x2x128xf32>
    %9 = vector.broadcast %8 : vector<1x2x128xf32> to vector<4x2x128xf32>
    %10 = arith.subf %4, %9 : vector<4x2x128xf32>
    %11 = math.exp %10 : vector<4x2x128xf32>
    %cst_8 = arith.constant dense<0.000000e+00> : vector<2x128xf32>
    %12 = vector.multi_reduction <add>, %11, %cst_8 [0] : vector<4x2x128xf32> to vector<2x128xf32>
    %13 = vector.shape_cast %12 : vector<2x128xf32> to vector<1x2x128xf32>
    %cst_9 = arith.constant 1.000000e+00 : f32
    %14 = vector.broadcast %cst_9 : f32 to vector<1x2x128xf32>
    %15 = arith.divf %14, %13 : vector<1x2x128xf32>
    %16 = vector.broadcast %15 : vector<1x2x128xf32> to vector<4x2x128xf32>
    %17 = arith.mulf %11, %16 : vector<4x2x128xf32>
    %18 = tpu.iota {dimensions = array<i32: 0>} : vector<4x2x128xi32>
    %19 = vector.shape_cast %6 : vector<2x128xi32> to vector<1x2x128xi32>
    %20 = vector.broadcast %19 : vector<1x2x128xi32> to vector<4x2x128xi32>
    %21 = arith.cmpi eq, %18, %20 : vector<4x2x128xi32>
    %22 = arith.mulf %17, %17 : vector<4x2x128xf32>
    %23 = arith.extui %21 : vector<4x2x128xi1> to vector<4x2x128xi32>
    %24 = arith.sitofp %23 : vector<4x2x128xi32> to vector<4x2x128xf32>
    %cst_10 = arith.constant 0.000000e+00 : f32
    %25 = vector.broadcast %cst_10 : f32 to vector<4x2x128xf32>
    %26 = arith.select %21, %17, %25 : vector<4x2x128xi1>, vector<4x2x128xf32>
    %27 = arith.addf %22, %24 : vector<4x2x128xf32>
    %c0_11 = arith.constant 0 : index
    %c0_12 = arith.constant 0 : index
    %c0_13 = arith.constant 0 : index
    %28 = vector.load %arg7[%c0_11, %c0_12, %c0_13] : memref<4x2x128xf32, #tpu.memory_space<vmem>>, vector<4x2x128xf32>
    %29 = arith.addf %28, %26 : vector<4x2x128xf32>
    %c0_14 = arith.constant 0 : index
    %c0_15 = arith.constant 0 : index
    %c0_16 = arith.constant 0 : index
    %30 = vector.load %arg7[%c0_14, %c0_15, %c0_16] : memref<4x2x128xf32, #tpu.memory_space<vmem>>, vector<4x2x128xf32>
    tpu.vector_store %arg7[%c0_14, %c0_15, %c0_16], %29 {strides = array<i32>} : memref<4x2x128xf32, #tpu.memory_space<vmem>>, vector<4x2x128xf32>,
    %c0_17 = arith.constant 0 : index
    %c0_18 = arith.constant 0 : index
    %c0_19 = arith.constant 0 : index
    %31 = vector.load %arg8[%c0_17, %c0_18, %c0_19] : memref<4x2x128xf32, #tpu.memory_space<vmem>>, vector<4x2x128xf32>
    %32 = arith.addf %31, %27 : vector<4x2x128xf32>
    %c0_20 = arith.constant 0 : index
    %c0_21 = arith.constant 0 : index
    %c0_22 = arith.constant 0 : index
    %33 = vector.load %arg8[%c0_20, %c0_21, %c0_22] : memref<4x2x128xf32, #tpu.memory_space<vmem>>, vector<4x2x128xf32>
    tpu.vector_store %arg8[%c0_20, %c0_21, %c0_22], %32 {strides = array<i32>} : memref<4x2x128xf32, #tpu.memory_space<vmem>>, vector<4x2x128xf32>,
    %c0_i32_23 = arith.constant 0 : i32
    %34 = arith.cmpi eq, %arg2, %c0_i32_23 : i32
    %35 = arith.extui %34 : i1 to i32
    %c0_i32_24 = arith.constant 0 : i32
    %36 = arith.cmpi ne, %35, %c0_i32_24 : i32
    scf.if %36 {
      %c0_25 = arith.constant 0 : index
      %c0_26 = arith.constant 0 : index
      %c0_27 = arith.constant 0 : index
      %37 = vector.load %arg7[%c0_25, %c0_26, %c0_27] : memref<4x2x128xf32, #tpu.memory_space<vmem>>, vector<4x2x128xf32>
      %cst_28 = arith.constant dense<0.000000e+00> : vector<4x2xf32>
      %38 = vector.multi_reduction <add>, %37, %cst_28 [2] : vector<4x2x128xf32> to vector<4x2xf32>
      %39 = vector.shape_cast %38 : vector<4x2xf32> to vector<4x2x1xf32>
      %cst_29 = arith.constant dense<0.000000e+00> : vector<4x1xf32>
      %40 = vector.multi_reduction <add>, %39, %cst_29 [1] : vector<4x2x1xf32> to vector<4x1xf32>
      %c0_30 = arith.constant 0 : index
      %c0_31 = arith.constant 0 : index
      %c0_32 = arith.constant 0 : index
      %c0_33 = arith.constant 0 : index
      %41 = vector.load %arg5[%c0_30, %c0_31, %c0_32, %c0_33] : memref<1x1x4x1xf32, #tpu.memory_space<vmem>>, vector<1x1x4x1xf32>
      %42 = vector.shape_cast %41 : vector<1x1x4x1xf32> to vector<4x1xf32>
      %43 = vector.shape_cast %40 : vector<4x1xf32> to vector<1x1x4x1xf32>
      tpu.vector_store %arg5[%c0_30, %c0_31, %c0_32, %c0_33], %43 {strides = array<i32>} : memref<1x1x4x1xf32, #tpu.memory_space<vmem>>, vector<1x1x4x1xf32>,
      %c0_34 = arith.constant 0 : index
      %c0_35 = arith.constant 0 : index
      %c0_36 = arith.constant 0 : index
      %44 = vector.load %arg8[%c0_34, %c0_35, %c0_36] : memref<4x2x128xf32, #tpu.memory_space<vmem>>, vector<4x2x128xf32>
      %cst_37 = arith.constant dense<0.000000e+00> : vector<4x2xf32>
      %45 = vector.multi_reduction <add>, %44, %cst_37 [2] : vector<4x2x128xf32> to vector<4x2xf32>
      %46 = vector.shape_cast %45 : vector<4x2xf32> to vector<4x2x1xf32>
      %cst_38 = arith.constant dense<0.000000e+00> : vector<4x1xf32>
      %47 = vector.multi_reduction <add>, %46, %cst_38 [1] : vector<4x2x1xf32> to vector<4x1xf32>
      %c0_39 = arith.constant 0 : index
      %c0_40 = arith.constant 0 : index
      %c0_41 = arith.constant 0 : index
      %c0_42 = arith.constant 0 : index
      %48 = vector.load %arg6[%c0_39, %c0_40, %c0_41, %c0_42] : memref<1x1x4x1xf32, #tpu.memory_space<vmem>>, vector<1x1x4x1xf32>
      %49 = vector.shape_cast %48 : vector<1x1x4x1xf32> to vector<4x1xf32>
      %50 = vector.shape_cast %47 : vector<4x1xf32> to vector<1x1x4x1xf32>
      tpu.vector_store %arg6[%c0_39, %c0_40, %c0_41, %c0_42], %50 {strides = array<i32>} : memref<1x1x4x1xf32, #tpu.memory_space<vmem>>, vector<1x1x4x1xf32>,
    } else {
    }
    return
  }
  func.func @transform_0(%arg0: i32, %arg1: i32, %arg2: i32) -> (i32, i32, i32, i32) {
    %c1_i32 = arith.constant 1 : i32
    %0 = arith.muli %arg0, %c1_i32 : i32
    %1 = arith.addi %0, %arg2 : i32
    %c0_i32 = arith.constant 0 : i32
    %c0_i32_0 = arith.constant 0 : i32
    %c0_i32_1 = arith.constant 0 : i32
    return %arg1, %c0_i32, %1, %c0_i32_0 : i32, i32, i32, i32
  }
  func.func @transform_1(%arg0: i32, %arg1: i32, %arg2: i32) -> (i32, i32, i32, i32) {
    %c1_i32 = arith.constant 1 : i32
    %0 = arith.muli %arg0, %c1_i32 : i32
    %1 = arith.addi %0, %arg2 : i32
    %c0_i32 = arith.constant 0 : i32
    %c0_i32_0 = arith.constant 0 : i32
    %c0_i32_1 = arith.constant 0 : i32
    return %arg1, %c0_i32, %1, %c0_i32_0 : i32, i32, i32, i32
  }
  func.func @transform_2(%arg0: i32, %arg1: i32, %arg2: i32) -> (i32, i32, i32, i32) {
    %c0_i32 = arith.constant 0 : i32
    %c0_i32_0 = arith.constant 0 : i32
    %c0_i32_1 = arith.constant 0 : i32
    return %arg0, %arg1, %c0_i32, %c0_i32_0 : i32, i32, i32, i32
  }
  func.func @transform_3(%arg0: i32, %arg1: i32, %arg2: i32) -> (i32, i32, i32, i32) {
    %c0_i32 = arith.constant 0 : i32
    %c0_i32_0 = arith.constant 0 : i32
    %c0_i32_1 = arith.constant 0 : i32
    return %arg0, %arg1, %c0_i32, %c0_i32_0 : i32, i32, i32, i32
  }
}

</mosaic_0001>

<bundles_post_ra>
// kernel: tpu_custom_call.1
= control target key start
LH: loop header
LB: loop body
LE: loop exit
PB: predicated region body
PF: predicated region fallthrough
CT: control target
= control target key end

     0   :  { %9 = vsyncpa [#allocation5], 0  ;;  %s1077_s0 = inlined_call_operand.hbm [shape: f32[2,4,2,128], index: 0, kind: input, shape index: {}]   ;;  %s1078_s1 = inlined_call_operand.hbm [shape: s32[2,1,2,128], index: 1, kind: input, shape index: {}]   ;;  %s1079_s2 = inlined_call_operand.vmem [shape: f32[1,2,4,1], index: 2, kind: output, shape index: {0}]   ;;  %s1080_s3 = inlined_call_operand.vmem [shape: f32[1,2,4,1], index: 3, kind: output, shape index: {1}]  }
   0x1   :  { %11 = vsyncpa [#allocation5 + $0x1], 0 }
   0x2   :  { %12 = vsyncpa [#allocation7], 0 }
   0x3   :  { %14 = vsyncpa [#allocation7 + $0x1], 0  ;;  %s918_s12 = smov 0   ;;  %s920_s13 = smov 0  }
   0x4   :  { %s922_s14 = smov 0   ;;  %s924_s15 = smov 0  }
   0x5   :  { %s926_s16 = smov 0   ;;  %s928_s17 = smov 0  }
   0x6 LB: > { %s685_s18 = sadd.s32 4294967295, %s893_s17   ;;  %s35_s19 = sadd.s32 1, %s889_s16  ;;  %s893_s17 = sphi %s928_s17, %s20_s17   ;;  %s889_s16 = sphi %s926_s16, %s1088_s16   ;;  %s885_s15 = sphi %s924_s15, %s1087_s15   ;;  %s881_s14 = sphi %s922_s14, %s1086_s14   ;;  %s877_s13 = sphi %s920_s13, %s1085_s13   ;;  %s873_s12 = sphi %s918_s12, %s1084_s12  }
   0x7   : > { %p37_p0 = scmp.ge.s32.totalorder %s35_s19, 2  ;;  %s50_s20 = sadd.s32 1, %s881_s14 }
   0x8   : > { %p57_p1 = scmp.ne.s32.totalorder %s881_s14, %s877_s13  ;;  %p58_p2 = scmp.eq.s32.totalorder %s893_s17, 0 }
   0x9   : > { %s1090_s19 = smov (%p37_p0, %s35_s19), 0  ;;  %p63_p4 = scmp.ne.s32.totalorder %s877_s13, %s873_s12 }
   0xa   : > { %p954_p3 = por %p58_p2, %p57_p1  ;;  %s45_s22 = ssub.s32 %s889_s16, %s1090_s19 }
   0xb   : > { %p64_p5 = scmp.eq.s32.totalorder %s685_s18, 0  ;;  %p48_p6 = scmp.eq.s32.totalorder %s45_s22, 0 }
   0xc   : > { %p717_p8 = scmp.lt.s32.totalorder %s893_s17, 2  ;;  %s173_s25 = sand.u32 1, %s881_s14  }
   0xd   : > { %p961_p7 = por %p64_p5, %p63_p4  ;;  %s705_s26 = sshll.u32 %s889_s16, 3 }
   0xe   : > { %s967_s24 = scalar_select %p48_p6, %s881_s14, %s50_s20  }
   0xf   : > { %s689_s27 = sshll.u32 %s173_s25, 3  ;;  %s184_s30 = scalar_lea.hbm %s1077_s0, %s705_s26 }
  0x10   : > { %s185_s4 = sshll.u32 %s184_s30, 4  ;;  %s177_s5 = scalar_lea.vmem [#allocation4], %s689_s27  ;;  %s186_s4 = int_to_ptr.hbm [resolvable:$true] %s185_s4 }
  0x11   : > { %s187_s6 = sshll.u32 %s177_s5, 4  ;;  %p976_p9 = pnand %p717_p8, %p954_p3  ;;  %s188_s6 = int_to_ptr.vmem [resolvable:$true] %s187_s6 }
  0x12   : > { %p694_p10 = scmp.ge.s32.totalorder %s893_s17, 1  ;;  %p216_p11 = scmp.lt.s32.totalorder %s893_s17, 3 }
  0x13   : > { %s174_s8 = scalar_lea.sflag [#allocation5], %s173_s25  ;;  %s895_s9 = smov 32  }
  0x14   : > { %s896_s10 = smov 2   ;;  %p217_p12 = pnand %p694_p10, %p216_p11 }
  0x15   : > { %713 = dma.hbm_to_vmem [thread:$0]  (!%p976_p9), %s186_s4, 128, %s188_s6, %s174_s8, %s895_s9, %s895_s9, %s896_s10  }
  0x16   : > { %s692_s11 = sshll.u32 %s173_s25, 1  ;;  %s693_s12 = sshll.u32 %s889_s16, 1 }
  0x17   : > { %s207_s21 = scalar_lea.hbm %s1078_s1, %s693_s12  ;;  %s201_s26 = scalar_lea.vmem [#allocation6], %s692_s11 }
  0x18   : > { %s209_s22 = sshll.u32 %s207_s21, 4  ;;  %s211_s27 = sshll.u32 %s201_s26, 4  ;;  %s210_s22 = int_to_ptr.hbm [resolvable:$true] %s209_s22  ;;  %s212_s27 = int_to_ptr.vmem [resolvable:$true] %s211_s27 }
  0x19   : > { %s198_s28 = scalar_lea.sflag [#allocation7], %s173_s25  ;;  %220 = sbr.rel (%p217_p12) target bundleno = 242 (0xf2), region = 28 }
  0x1a   : > { %716 = dma.hbm_to_vmem [thread:$0]  (!%p976_p9), %s210_s22, 32, %s212_s27, %s198_s28  }
  0x1b   : > { %s222_s29 = sand.u32 (!%p217_p12), 1, %s877_s13  }
  0x1c   : > { %s695_s30 = sshll.u32 (!%p217_p12), %s222_s29, 3  ;;  %s223_s4 = scalar_lea.sflag (!%p217_p12), [#allocation5], %s222_s29 }
  0x1d   : > { %s226_s5 = scalar_lea.vmem (!%p217_p12), [#allocation4], %s695_s30 }
  0x1e   : > { %864 = dma.done.wait (%p961_p7), %s223_s4, 128  }
  0x1f   : > { %866 = vsyncadd (%p961_p7), %s223_s4, 4294967168  ;;  %s696_s6 = sshll.u32 %s222_s29, 1  ;;  %s233_s8 = scalar_lea.sflag [#allocation7], %s222_s29 }
  0x20   : > { %s995_s9 = scalar_lea.vmem [#allocation6], %s696_s6 }
  0x21   : > { %868 = dma.done.wait (%p961_p7), %s233_s8, 32  }
  0x22   : > { %870 = vsyncadd (%p961_p7), %s233_s8, 4294967264  ;;  %v897_v0 = vmov 0.0   ;;  %vm311_vm0 = vcmask 1041408   ;;  %v306_v1 = vld [vmem:[%s226_s5] sm:$0x3]  ;;  %p280_p13 = scmp.lt.s32.totalorder %s885_s15, 1 }
  0x23   : > { %298 = vst [vmem:[#allocation2] sm:$0x3] %v897_v0  ;;  %v307_v2 = vld [vmem:[%s226_s5 + $0x2] sm:$0x3]  ;;  %v308_v3 = vld [vmem:[%s226_s5 + $0x4] sm:$0x3] }
  0x24   : > { %299 = vst [vmem:[#allocation2 + $0x2] sm:$0x3] %v897_v0  ;;  %v309_v4 = vld [vmem:[%s226_s5 + $0x6] sm:$0x3]  ;;  %v312_v5 = vsel %vm311_vm0, %v306_v1, -inf  ;;  %v313_v6 = vsel %vm311_vm0, %v307_v2, -inf }
  0x25   : > { %300 = vst [vmem:[#allocation2 + $0x4] sm:$0x3] %v897_v0  ;;  %v314_v7 = vsel %vm311_vm0, %v308_v3, -inf  ;;  %v315_v8 = vsel %vm311_vm0, %v309_v4, -inf  ;;  %v316_v9 = vmax.f32 %v312_v5, %v313_v6  ;;  %v310_v37 = vld [vmem:[%s995_s9] sm:$0x3] }
  0x26   : > { %301 = vst [vmem:[#allocation2 + $0x6] sm:$0x3] %v897_v0  ;;  %v317_v10 = vmax.f32 %v314_v7, %v315_v8  ;;  %vm357_vm5 = vcmp.eq.s32.totalorder %v310_v37, 0  ;;  %vm358_vm6 = vcmp.eq.s32.totalorder %v310_v37, 1  ;;  %vm360_vm7 = vcmp.eq.s32.totalorder %v310_v37, 3  ;;  %s1092_s15 = smov (!%p280_p13, %s885_s15), 1 }
  0x27   : > { %302 = vst [vmem:[#allocation3] sm:$0x3] %v897_v0  ;;  %vm359_vm8 = vcmp.eq.s32.totalorder %v310_v37, 2  ;;  %v699_v49 = vsel %vm357_vm5, 1.0, %v897_v0  ;;  %v700_v51 = vsel %vm358_vm6, 1.0, %v897_v0  ;;  %v702_v52 = vsel %vm360_vm7, 1.0, %v897_v0 }
  0x28   : > { %303 = vst [vmem:[#allocation3 + $0x2] sm:$0x3] %v897_v0  ;;  %v318_v11 = vmax.f32 %v316_v9, %v317_v10  ;;  %v701_v50 = vsel %vm359_vm8, 1.0, %v897_v0  ;;  %vm456_vm9 = vcmask 1041409   ;;  %s697_s23 = sshll.u32 %s1092_s15, 2  ;;  %vm458_vm10 = vcmask 1042434  }
  0x29   : > { %304 = vst [vmem:[#allocation3 + $0x4] sm:$0x3] %v897_v0  ;;  %vm460_vm11 = vcmask 1043459   ;;  %s285_s10 = scalar_lea.vmem %s1079_s2, %s697_s23  ;;  %vm463_vm12 = vcmask 3072   ;;  %s293_s12 = scalar_lea.vmem %s1080_s3, %s697_s23 }
  0x2a   : > { %305 = vst [vmem:[#allocation3 + $0x6] sm:$0x3] %v897_v0  ;;  %v319_v12 = vsub.f32 %v306_v1, %v318_v11  ;;  %v320_v13 = vsub.f32 %v307_v2, %v318_v11  ;;  %v321_v14 = vsub.f32 %v308_v3, %v318_v11  ;;  %v322_v15 = vsub.f32 %v309_v4, %v318_v11  ;;  %v381_v43 = vld [vmem:[#allocation2] sm:$0x3] }
  0x2b   : > { %v382_v47 = vld [vmem:[#allocation2 + $0x2] sm:$0x3] }
  0x2c   : > { %v323_v16 = vmul.f32 1.442695, %v319_v12  ;;  %v325_v17 = vmul.f32 1.442695, %v320_v13  ;;  %v327_v18 = vmul.f32 1.442695, %v321_v14 }
  0x2d   : > { %v329_v19 = vmul.f32 1.442695, %v322_v15  ;;  %v383_v45 = vld [vmem:[#allocation2 + $0x4] sm:$0x3]  ;;  %v384_v3 = vld [vmem:[#allocation2 + $0x6] sm:$0x3] }
  0x2e   : > { %769 = vpow2.f32 %v323_v16  ;;  %v393_v58 = vld [vmem:[#allocation3] sm:$0x3] }
  0x2f   : > { %771 = vpow2.f32 %v325_v17  ;;  %v394_v63 = vld [vmem:[#allocation3 + $0x2] sm:$0x3] }
  0x30   : > { %773 = vpow2.f32 %v327_v18  ;;  %v395_v5 = vld [vmem:[#allocation3 + $0x4] sm:$0x3] }
  0x31   : > { %775 = vpow2.f32 %v329_v19  ;;  %v396_v6 = vld [vmem:[#allocation3 + $0x6] sm:$0x3] }
  0x34   : > { %v770_v20 = vpop.eup %769 }
  0x35   : > { %v772_v21 = vpop.eup %771  ;;  %v331_v22 = vsel %vm311_vm0, %v770_v20, 0.0 }
  0x36   : > { %v774_v23 = vpop.eup %773  ;;  %v332_v24 = vsel %vm311_vm0, %v772_v21, 0.0 }
  0x37   : > { %v776_v25 = vpop.eup %775  ;;  %v333_v26 = vadd.f32 %v332_v24, %v331_v22  ;;  %v334_v27 = vsel %vm311_vm0, %v774_v23, 0.0 }
  0x38   : > { %v336_v28 = vsel %vm311_vm0, %v776_v25, 0.0 }
  0x39   : > { %v335_v29 = vadd.f32 %v334_v27, %v333_v26 }
  0x3b   : > { %v337_v30 = vadd.f32 %v336_v28, %v335_v29 }
  0x3d   : > { %777 = vrcp.f32 %v337_v30  ;;  %v349_v33 = vand.u32 2147483648, %v337_v30  ;;  %vm343_vm1 = vweird.f32 %v337_v30  ;;  %v347_v35 = vand.u32 2147483647, %v337_v30 }
  0x3f   : > { %v350_v38 = vor.u32 1.1754944e-38, %v349_v33  ;;  %vm348_vm4 = vcmp.eq.f32.partialorder %v347_v35, 8.507059e+37 }
  0x43   : > { %v778_v31 = vpop.eup %777 }
  0x44   : > { %v339_v32 = vmul.f32 %v778_v31, %v337_v30  ;;  %vm344_vm2 = vweird.f32 %v778_v31 }
  0x45   : > { %vm345_vm3 = vmor %vm343_vm1, %vm344_vm2 }
  0x46   : > { %v340_v34 = vsub.f32 1.0, %v339_v32 }
  0x48   : > { %v341_v36 = vmul.f32 %v778_v31, %v340_v34 }
  0x4a   : > { %v342_v39 = vadd.f32 %v778_v31, %v341_v36 }
  0x4c   : > { %v346_v40 = vsel %vm345_vm3, %v778_v31, %v342_v39 }
  0x4d   : > { %v351_v41 = vsel %vm348_vm4, %v350_v38, %v346_v40 }
  0x4e   : > { %v353_v42 = vmul.f32 %v770_v20, %v351_v41  ;;  %v355_v44 = vmul.f32 %v774_v23, %v351_v41  ;;  %v354_v46 = vmul.f32 %v772_v21, %v351_v41  ;;  %v356_v48 = vmul.f32 %v776_v25, %v351_v41 }
  0x50   : > { %v373_v53 = vsel %vm357_vm5, %v353_v42, 0.0  ;;  %v361_v54 = vmul.f32 %v353_v42, %v353_v42  ;;  %v375_v55 = vsel %vm359_vm8, %v355_v44, 0.0  ;;  %v374_v56 = vsel %vm358_vm6, %v354_v46, 0.0 }
  0x51   : > { %v385_v57 = vadd.f32 %v381_v43, %v373_v53  ;;  %v387_v59 = vadd.f32 %v383_v45, %v375_v55  ;;  %v386_v60 = vadd.f32 %v382_v47, %v374_v56  ;;  %v362_v61 = vmul.f32 %v354_v46, %v354_v46 }
  0x52   : > { %v377_v62 = vadd.f32 %v699_v49, %v361_v54  ;;  %v363_v1 = vmul.f32 %v355_v44, %v355_v44  ;;  %v376_v2 = vsel %vm360_vm7, %v356_v48, 0.0  ;;  %v364_v4 = vmul.f32 %v356_v48, %v356_v48 }
  0x53   : > { %389 = vst [vmem:[#allocation2] sm:$0x3] %v385_v57  ;;  %v378_v0 = vadd.f32 %v700_v51, %v362_v61  ;;  %v388_v11 = vadd.f32 %v384_v3, %v376_v2 }
  0x54   : > { %v397_v7 = vadd.f32 %v393_v58, %v377_v62  ;;  %391 = vst [vmem:[#allocation2 + $0x4] sm:$0x3] %v387_v59  ;;  %v379_v8 = vadd.f32 %v701_v50, %v363_v1  ;;  %v380_v9 = vadd.f32 %v702_v52, %v364_v4 }
  0x55   : > { %390 = vst [vmem:[#allocation2 + $0x2] sm:$0x3] %v386_v60  ;;  %v398_v10 = vadd.f32 %v394_v63, %v378_v0 }
  0x56   : > { %401 = vst [vmem:[#allocation3] sm:$0x3] %v397_v7  ;;  %v399_v12 = vadd.f32 %v395_v5, %v379_v8  ;;  %v400_v13 = vadd.f32 %v396_v6, %v380_v9 }
  0x57   : > { %402 = vst [vmem:[#allocation3 + $0x2] sm:$0x3] %v398_v10 }
  0x58   : > { %403 = vst [vmem:[#allocation3 + $0x4] sm:$0x3] %v399_v12 }
  0x59   : > { %392 = vst [vmem:[#allocation2 + $0x6] sm:$0x3] %v388_v11 }
  0x5a   : > { %v408_v14 = vld [vmem:[#allocation2] sm:$0x3]  ;;  %404 = vst [vmem:[#allocation3 + $0x6] sm:$0x3] %v400_v13 }
  0x5b   : > { %v412_v15 = vsel %vm311_vm0, %v408_v14, 0.0  ;;  %v410_v16 = vld [vmem:[#allocation2 + $0x4] sm:$0x3] }
  0x5c   : > { %413 = vadd.xlane.f32.xlu0 %v412_v15  ;;  %v418_v17 = vsel %vm311_vm0, %v410_v16, 0.0  ;;  %v409_v20 = vld [vmem:[#allocation2 + $0x2] sm:$0x3] }
  0x5d   : > { %v465_v18 = vld [vmem:[#allocation3] sm:$0x3]  ;;  %419 = vadd.xlane.f32.xlu2 %v418_v17  ;;  %v415_v22 = vsel %vm311_vm0, %v409_v20, 0.0 }
  0x5e   : > { %v469_v19 = vsel %vm311_vm0, %v465_v18, 0.0  ;;  %v466_v23 = vld [vmem:[#allocation3 + $0x2] sm:$0x3] }
  0x5f   : > { %470 = vadd.xlane.f32.xlu1 %v469_v19  ;;  %v467_v21 = vld [vmem:[#allocation3 + $0x4] sm:$0x3]  ;;  %v472_v25 = vsel %vm311_vm0, %v466_v23, 0.0 }
  0x60   : > { %v475_v24 = vsel %vm311_vm0, %v467_v21, 0.0  ;;  %v411_v26 = vld [vmem:[#allocation2 + $0x6] sm:$0x3] }
  0x61   : > { %v421_v27 = vsel %vm311_vm0, %v411_v26, 0.0  ;;  %v468_v28 = vld [vmem:[#allocation3 + $0x6] sm:$0x3] }
  0x62   : > { %v478_v29 = vsel %vm311_vm0, %v468_v28, 0.0 }
  0x64   : > { %416 = vadd.xlane.f32.xlu0 %v415_v22 }
  0x65   : > { %476 = vadd.xlane.f32.xlu2 %v475_v24 }
  0x67   : > { %473 = vadd.xlane.f32.xlu1 %v472_v25 }
  0x6c   : > { %422 = vadd.xlane.f32.xlu0 %v421_v27 }
  0x6f   : > { %479 = vadd.xlane.f32.xlu1 %v478_v29 }
  0xcf   : > { %v414_v30 = vpop.xlane.xlu0 %413 }
  0xd0   : > { %v424_v31 = vsel %vm311_vm0, %v414_v30, 0.0  ;;  %v420_v32 = vpop.xlane.xlu2 %419 }
  0xd1   : > { %v425_v34 = vrot.slane %v424_v31, 4  ;;  %v438_v36 = vsel %vm311_vm0, %v420_v32, 0.0 }
  0xd2   : > { %v471_v33 = vpop.xlane.xlu1 %470  ;;  %v439_v38 = vrot.slane %v438_v36, 4 }
  0xd3   : > { %v481_v35 = vsel %vm311_vm0, %v471_v33, 0.0  ;;  %v426_v39 = vadd.f32 %v425_v34, %v424_v31 }
  0xd4   : > { %v482_v37 = vrot.slane %v481_v35, 4  ;;  %v440_v46 = vadd.f32 %v439_v38, %v438_v36 }
  0xd5   : > { %v427_v49 = vrot.slane %v426_v39, 2 }
  0xd6   : > { %v483_v45 = vadd.f32 %v482_v37, %v481_v35  ;;  %v441_v56 = vrot.slane %v440_v46, 2 }
  0xd7   : > { %v417_v40 = vpop.xlane.xlu0 %416  ;;  %v428_v58 = vadd.f32 %v427_v49, %v426_v39 }
  0xd8   : > { %v431_v41 = vsel %vm311_vm0, %v417_v40, 0.0  ;;  %v477_v42 = vpop.xlane.xlu2 %476  ;;  %v484_v55 = vrot.slane %v483_v45, 2  ;;  %v442_v4 = vadd.f32 %v441_v56, %v440_v46 }
  0xd9   : > { %v432_v43 = vrot.slane %v431_v41, 4  ;;  %v495_v44 = vsel %vm311_vm0, %v477_v42, 0.0  ;;  %v429_v6 = vrot.slane %v428_v58, 1 }
  0xda   : > { %v474_v47 = vpop.xlane.xlu1 %473  ;;  %v496_v48 = vrot.slane %v495_v44, 4  ;;  %v485_v3 = vadd.f32 %v484_v55, %v483_v45  ;;  %v443_v15 = vrot.slane %v442_v4, 1 }
  0xdb   : > { %v433_v50 = vadd.f32 %v432_v43, %v431_v41  ;;  %v488_v51 = vsel %vm311_vm0, %v474_v47, 0.0  ;;  %v430_v17 = vadd.f32 %v429_v6, %v428_v58 }
  0xdc   : > { %v489_v52 = vrot.slane %v488_v51, 4  ;;  %v497_v53 = vadd.f32 %v496_v48, %v495_v44  ;;  %v486_v14 = vrot.slane %v485_v3, 1  ;;  %v444_v25 = vadd.f32 %v443_v15, %v442_v4 }
  0xdd   : > { %v434_v54 = vrot.slane %v433_v50, 2 }
  0xde   : > { %v490_v57 = vadd.f32 %v489_v52, %v488_v51  ;;  %v498_v60 = vrot.slane %v497_v53, 2  ;;  %v487_v24 = vadd.f32 %v486_v14, %v485_v3 }
  0xdf   : > { %v435_v59 = vadd.f32 %v434_v54, %v433_v50  ;;  %v423_v61 = vpop.xlane.xlu0 %422 }
  0xe0   : > { %v491_v62 = vrot.slane %v490_v57, 2  ;;  %v445_v63 = vsel %vm311_vm0, %v423_v61, 0.0  ;;  %v499_v7 = vadd.f32 %v498_v60, %v497_v53 }
  0xe1   : > { %v436_v1 = vrot.slane %v435_v59, 1  ;;  %v446_v2 = vrot.slane %v445_v63, 4 }
  0xe2   : > { %v492_v0 = vadd.f32 %v491_v62, %v490_v57  ;;  %v480_v5 = vpop.xlane.xlu1 %479  ;;  %v500_v18 = vrot.slane %v499_v7, 1 }
  0xe3   : > { %v447_v8 = vadd.f32 %v446_v2, %v445_v63  ;;  %v502_v9 = vsel %vm311_vm0, %v480_v5, 0.0  ;;  %v437_v12 = vadd.f32 %v436_v1, %v435_v59 }
  0xe4   : > { %v493_v10 = vrot.slane %v492_v0, 1  ;;  %v503_v11 = vrot.slane %v502_v9, 4  ;;  %v501_v27 = vadd.f32 %v500_v18, %v499_v7 }
  0xe5   : > { %v448_v13 = vrot.slane %v447_v8, 2  ;;  %v457_v22 = vsel %vm456_vm9, %v437_v12, %v430_v17 }
  0xe6   : > { %v504_v16 = vadd.f32 %v503_v11, %v502_v9  ;;  %v494_v20 = vadd.f32 %v493_v10, %v492_v0  ;;  %v459_v30 = vsel %vm458_vm10, %v444_v25, %v457_v22 }
  0xe7   : > { %v449_v19 = vadd.f32 %v448_v13, %v447_v8 }
  0xe8   : > { %v505_v21 = vrot.slane %v504_v16, 2  ;;  %v513_v29 = vsel %vm456_vm9, %v494_v20, %v487_v24 }
  0xe9   : > { %v450_v23 = vrot.slane %v449_v19, 1  ;;  %v514_v34 = vsel %vm458_vm10, %v501_v27, %v513_v29 }
  0xea   : > { %v506_v26 = vadd.f32 %v505_v21, %v504_v16 }
  0xeb   : > { %v451_v28 = vadd.f32 %v450_v23, %v449_v19 }
  0xec   : > { %v507_v31 = vrot.slane %v506_v26, 1 }
  0xed   : > { %v461_v32 = vsel %vm460_vm11, %v451_v28, %v459_v30 }
  0xee   : > { %464 = vst.msk [vmem:[%s285_s10] sm:$0xf] %vm463_vm12, %v461_v32  ;;  %v508_v33 = vadd.f32 %v507_v31, %v506_v26 }
  0xf0   : > { %v515_v35 = vsel %vm460_vm11, %v508_v33, %v514_v34 }
  0xf1   : > { %517 = vst.msk [vmem:[%s293_s12] sm:$0xf] %vm463_vm12, %v515_v35 }
  0xf2 PF: > { %s20_s17 = sadd.s32 1, %s893_s17   ;;  %s1084_s12 = smov %s877_s13 }
  0xf3   : > { %p17_p0 = scmp.ge.s32.totalorder %s20_s17, 4   ;;  %s1085_s13 = smov %s881_s14 }
  0xf4   : > { %s1086_s14 = smov %s967_s24  ;;  %s1087_s15 = smov %s889_s16 }
  0xf5   : > { %s1088_s16 = smov %s1090_s19  ;;  %19 = sbr.rel (!%p17_p0) target bundleno = 6 (0x6), region = 101 }
  0xfa   :  { %567 = vsyncpa [#allocation5], 1 }
  0xfb   :  { %569 = vsyncpa [#allocation5 + $0x1], 1 }
  0xfc   :  { %570 = vsyncpa [#allocation7], 1 }
  0xfd   :  { %572 = vsyncpa [#allocation7 + $0x1], 1 }

</bundles_post_ra>
